<compile_context>
chip_gen: v5e
topology: v5e:2x2
jax: 0.10.0
libtpu: 0.0.40
codegen_flags: <defaults>
</compile_context>

<pallas_src>
import functools

import jax
import jax.numpy as jnp
from jax.experimental import pallas as pl
from jax.experimental.pallas import tpu as pltpu

_HASH_MULT = -1640531535  # int32 view of Knuth's 2654435761


def _round_up(a, b):
    return ((a + b - 1) // b) * b


def _on_tpu() -> bool:
    try:
        return jax.devices()[0].platform == "tpu"
    except Exception:  # pragma: no cover - defensive
        return False


# ---------------------------------------------------------------------------
# Kernels
# ---------------------------------------------------------------------------
def _poisson_noise_prng_kernel(seed_ref, x_ref, o_ref, *, inv_wc):
    """TPU path: on-chip stateful PRNG, one independent stream per tile."""
    # Hash the grid index into the seed so adjacent tiles do not get
    # consecutive (potentially correlated) seeds.
    pltpu.prng_seed(seed_ref[0] ^ (pl.program_id(0) * jnp.int32(_HASH_MULT)))

    x = x_ref[...].astype(jnp.float32)            # HBM load stays in input dtype
    noise = pltpu.stateful_normal(x.shape, jnp.float32)
    # (x*wc + sqrt(x*wc)*n) / wc == x + sqrt(x/wc)*n ; sqrt(0)=0 so padding is safe.
    y = x + jnp.sqrt(x * inv_wc) * noise
    o_ref[...] = jnp.clip(y, 0.0, 1.0).astype(o_ref.dtype)


def _poisson_noise_fused_kernel(x_ref, n_ref, o_ref, *, inv_wc):
    """Portable path (interpret / non-TPU): noise is a precomputed input."""
    x = x_ref[...].astype(jnp.float32)
    y = x + jnp.sqrt(x * inv_wc) * n_ref[...].astype(jnp.float32)
    o_ref[...] = jnp.clip(y, 0.0, 1.0).astype(o_ref.dtype)


# ---------------------------------------------------------------------------
# Wrapper
# ---------------------------------------------------------------------------
def _choose_lane(n: int) -> int:
    # Prefer a lane width that divides n exactly so no padding copy is needed.
    for lane in (1024, 512, 256, 128):
        if n % lane == 0:
            return lane
    return 128  # pad only the (< 128-element) sub-lane remainder


def _choose_tile_rows(rows: int) -> int:
    if rows <= 8:
        return rows                       # single block == full array, no raggedness
    t = min(1024, _round_up(rows, 8))     # 4 MiB f32 blocks amortize per-step overhead
    if pl.cdiv(rows, t) < 2:              # keep >= 2 grid steps for v7x megacore
        t = max(8, _round_up(pl.cdiv(rows, 2), 8))
    return t


def poisson_noise(x: jax.Array, seed: int = 0, well_capacity: float = 10500.0) -> jax.Array:
    """Pallas-backed equivalent of PyTorch PoissonNoise.forward."""
    orig_shape = x.shape
    orig_dtype = x.dtype
    n = x.size
    inv_wc = 1.0 / float(well_capacity)

    lane = _choose_lane(n)
    n_pad = _round_up(n, lane)
    padded = n_pad != n

    flat = x.reshape(-1)
    if padded:
        # Zero padding is safe: x=0 -> sqrt term 0 -> output 0 (no NaNs).
        flat = jnp.pad(flat, (0, n_pad - n))
    rows = n_pad // lane
    x2d = flat.reshape(rows, lane)

    tile_rows = _choose_tile_rows(rows)
    grid = (pl.cdiv(rows, tile_rows),)    # ragged last block handled by Pallas

    compiler_params = pltpu.CompilerParams(
        dimension_semantics=("parallel",),        # independent tiles -> megacore
        vmem_limit_bytes=48 * 1024 * 1024,        # <= 48 MiB, safe on v5e/v6e/v7x
    )

    if _on_tpu():
        seed_arr = jnp.asarray([seed], dtype=jnp.int32)
        out2d = pl.pallas_call(
            functools.partial(_poisson_noise_prng_kernel, inv_wc=inv_wc),
            out_shape=jax.ShapeDtypeStruct((rows, lane), orig_dtype),
            grid_spec=pltpu.PrefetchScalarGridSpec(
                num_scalar_prefetch=1,            # seed lives in SMEM
                grid=grid,
                in_specs=[pl.BlockSpec((tile_rows, lane), lambda i, seed: (i, 0))],
                out_specs=pl.BlockSpec((tile_rows, lane), lambda i, seed: (i, 0)),
            ),
            compiler_params=compiler_params,
        )(seed_arr, x2d)
    else:
        # TODO(synk): pltpu.prng_seed/stateful_normal have no CPU/interpret
        # lowering; on non-TPU backends the normals are drawn with jax.random
        # and only the FMA + clamp is fused in the Pallas kernel.
        noise2d = jax.random.normal(jax.random.PRNGKey(seed), (rows, lane), dtype=jnp.float32)
        out2d = pl.pallas_call(
            functools.partial(_poisson_noise_fused_kernel, inv_wc=inv_wc),
            out_shape=jax.ShapeDtypeStruct((rows, lane), orig_dtype),
            grid=grid,
            in_specs=[pl.BlockSpec((tile_rows, lane), lambda i: (i, 0)),
                      pl.BlockSpec((tile_rows, lane), lambda i: (i, 0))],
            out_specs=pl.BlockSpec((tile_rows, lane), lambda i: (i, 0)),
            compiler_params=compiler_params,
        )(x2d, noise2d)

    out = out2d.reshape(-1)
    if padded:
        out = out[:n]
    return out.reshape(orig_shape)


class PoissonNoise:
    """Mirror of the PyTorch PoissonNoise module."""

    def __init__(self, well_capacity=10500):
        self.well_capacity = well_capacity

    def __call__(self, x, seed: int = 0):
        return poisson_noise(x, seed=seed, well_capacity=self.well_capacity)


if __name__ == "__main__":
    key = jax.random.PRNGKey(0)
    # NCHW image-like input in [0, 1] (sensor-noise model domain).
    x = jax.random.uniform(key, (2, 4, 16, 16), dtype=jnp.float32)

    mod = PoissonNoise(well_capacity=10500)
    y = jax.block_until_ready(mod(x, seed=0))

    assert y.shape == x.shape, y.shape
    assert y.dtype == x.dtype, y.dtype
    assert bool(jnp.all(jnp.isfinite(y)))
    assert bool(jnp.all(y >= 0.0)) and bool(jnp.all(y <= 1.0))
    # Noise std is sqrt(x/wc) <= ~0.01, so output stays very close to input.
    assert float(jnp.max(jnp.abs(y - jnp.clip(x, 0.0, 1.0)))) < 0.1
    # Noise was actually applied (not an identity copy).
    assert float(jnp.std(y - x)) > 0.0

    print("KERNEL_OK")
</pallas_src>

<mosaic_0001>
module attributes {stable_mosaic.version = 11 : i64} {
  func.func @_poisson_noise_fused_kernel(%arg0: i32, %arg1: memref<2x1024xf32, #tpu.memory_space<vmem>>, %arg2: memref<2x1024xf32, #tpu.memory_space<vmem>>, %arg3: memref<2x1024xf32, #tpu.memory_space<vmem>>) attributes {dimension_semantics = [#tpu.dimension_semantics<parallel>], iteration_bounds = array<i64: 1>, scalar_prefetch = 0 : i64, scratch_operands = 0 : i64, tpu.core_type = #tpu.core_type<tc>, window_params = [{transform_indices = @transform_0, window_bounds = array<i64: 2, 1024>}, {transform_indices = @transform_1, window_bounds = array<i64: 2, 1024>}, {transform_indices = @transform_2, window_bounds = array<i64: 2, 1024>}]} {
    %c0 = arith.constant 0 : index
    %c0_0 = arith.constant 0 : index
    %0 = vector.load %arg1[%c0, %c0_0] : memref<2x1024xf32, #tpu.memory_space<vmem>>, vector<2x1024xf32>
    %cst = arith.constant 9.52380942E-5 : f32
    %1 = vector.broadcast %cst : f32 to vector<2x1024xf32>
    %2 = arith.mulf %0, %1 : vector<2x1024xf32>
    %3 = math.sqrt %2 : vector<2x1024xf32>
    %c0_1 = arith.constant 0 : index
    %c0_2 = arith.constant 0 : index
    %4 = vector.load %arg2[%c0_1, %c0_2] : memref<2x1024xf32, #tpu.memory_space<vmem>>, vector<2x1024xf32>
    %5 = arith.mulf %3, %4 : vector<2x1024xf32>
    %6 = arith.addf %0, %5 : vector<2x1024xf32>
    %cst_3 = arith.constant 0.000000e+00 : f32
    %cst_4 = arith.constant 1.000000e+00 : f32
    %7 = vector.broadcast %cst_3 : f32 to vector<2x1024xf32>
    %8 = arith.maximumf %7, %6 : vector<2x1024xf32>
    %9 = vector.broadcast %cst_4 : f32 to vector<2x1024xf32>
    %10 = arith.minimumf %9, %8 : vector<2x1024xf32>
    %c0_5 = arith.constant 0 : index
    %c0_6 = arith.constant 0 : index
    %11 = vector.load %arg3[%c0_5, %c0_6] : memref<2x1024xf32, #tpu.memory_space<vmem>>, vector<2x1024xf32>
    tpu.vector_store %arg3[%c0_5, %c0_6], %10 {strides = array<i32>} : memref<2x1024xf32, #tpu.memory_space<vmem>>, vector<2x1024xf32>,
    return
  }
  func.func @transform_0(%arg0: i32) -> (i32, i32) {
    %c0_i32 = arith.constant 0 : i32
    %c0_i32_0 = arith.constant 0 : i32
    return %arg0, %c0_i32 : i32, i32
  }
  func.func @transform_1(%arg0: i32) -> (i32, i32) {
    %c0_i32 = arith.constant 0 : i32
    %c0_i32_0 = arith.constant 0 : i32
    return %arg0, %c0_i32 : i32, i32
  }
  func.func @transform_2(%arg0: i32) -> (i32, i32) {
    %c0_i32 = arith.constant 0 : i32
    %c0_i32_0 = arith.constant 0 : i32
    return %arg0, %c0_i32 : i32, i32
  }
}

</mosaic_0001>

<bundles_post_ra>
// kernel: tpu_custom_call.1
= control target key start
LH: loop header
LB: loop body
LE: loop exit
PB: predicated region body
PF: predicated region fallthrough
CT: control target
= control target key end

     0   :  { %7 = vsyncpa [#allocation3], 0  ;;  %s210_s0 = inlined_call_operand.hbm [shape: f32[2,1024], index: 0, kind: input, shape index: {}]   ;;  %s211_s1 = inlined_call_operand.hbm [shape: f32[2,1024], index: 1, kind: input, shape index: {}]   ;;  %s212_s2 = inlined_call_operand.hbm [shape: f32[2,1024], index: 2, kind: output, shape index: {}]  }
   0x1   :  { %8 = vsyncpa [#allocation6], 0 }
   0x2   :  { %9 = vsyncpa [#allocation4], 0  ;;  %s15_s11 = sshll.u32 %s210_s0, 4  ;;  %s183_s12 = smov [#allocation2]   ;;  %s16_s11 = int_to_ptr.hbm [resolvable:$true] %s15_s11 }
   0x3   :  { %s17_s13 = sshll.u32 %s183_s12, 4  ;;  %s26_s16 = sshll.u32 %s211_s1, 4  ;;  %s18_s13 = int_to_ptr.vmem [resolvable:$true] %s17_s13  ;;  %s27_s16 = int_to_ptr.hbm [resolvable:$true] %s26_s16 }
   0x4   :  { %20 = dma.hbm_to_vmem [thread:$0]  %s16_s11, 256, %s18_s13, [#allocation3]  }
   0x5   :  { %s184_s17 = smov [#allocation5]  }
   0x6   :  { %s28_s18 = sshll.u32 %s184_s17, 4  ;;  %s29_s18 = int_to_ptr.vmem [resolvable:$true] %s28_s18 }
   0x7   :  { %31 = dma.hbm_to_vmem [thread:$0]  %s27_s16, 256, %s29_s18, [#allocation6]  }
   0x8   :  { %177 = dma.done.wait [#allocation3], 256  }
   0x9   :  { %178 = vsyncadd [#allocation3], 4294967040 }
   0xa   :  { %179 = dma.done.wait [#allocation6], 256  }
   0xb   :  { %180 = vsyncadd [#allocation6], 4294967040  ;;  %v40_v0 = vld [vmem:[#allocation2] sm:$0xff]  ;;  %v41_v1 = vld [vmem:[#allocation2 + $0x8] sm:$0xff]  ;;  %s185_s0 = smov [#allocation7]   ;;  %s87_s21 = sshll.u32 %s212_s2, 4  ;;  %s88_s21 = int_to_ptr.hbm [resolvable:$true] %s87_s21 }
   0xc   :  { %v42_v2 = vmul.f32 9.5238094e-05, %v40_v0  ;;  %v43_v3 = vmul.f32 9.5238094e-05, %v41_v1  ;;  %v68_v19 = vld [vmem:[#allocation5] sm:$0xff]  ;;  %v69_v22 = vld [vmem:[#allocation5 + $0x8] sm:$0xff] }
   0xd   :  { %s85_s1 = sshll.u32 %s185_s0, 4  ;;  %s86_s1 = int_to_ptr.vmem [resolvable:$true] %s85_s1 }
   0xe   :  { %101 = vrsqrt.f32 %v42_v2  ;;  %vm51_vm0 = vcmp.eq.f32.partialorder %v42_v2, inf  ;;  %v54_v15 = vand.u32 2147483648, %v42_v2  ;;  %vm53_vm1 = vcmp.eq.f32.partialorder %v42_v2, 0.0 }
   0xf   :  { %103 = vrsqrt.f32 %v43_v3  ;;  %vm63_vm2 = vcmp.eq.f32.partialorder %v43_v3, inf  ;;  %v66_v18 = vand.u32 2147483648, %v43_v3  ;;  %vm65_vm3 = vcmp.eq.f32.partialorder %v43_v3, 0.0 }
  0x14   :  { %v102_v4 = vpop.eup %101 }
  0x15   :  { %v104_v5 = vpop.eup %103  ;;  %v45_v6 = vmul.f32 %v102_v4, %v42_v2 }
  0x16   :  { %v57_v7 = vmul.f32 %v104_v5, %v43_v3 }
  0x17   :  { %v46_v8 = vmul.f32 %v102_v4, %v45_v6 }
  0x18   :  { %v58_v9 = vmul.f32 %v104_v5, %v57_v7 }
  0x19   :  { %v47_v10 = vmul.f32 0.5, %v46_v8 }
  0x1a   :  { %v59_v11 = vmul.f32 0.5, %v58_v9 }
  0x1b   :  { %v48_v12 = vsub.f32 1.5, %v47_v10 }
  0x1c   :  { %v60_v13 = vsub.f32 1.5, %v59_v11 }
  0x1d   :  { %v49_v14 = vmul.f32 %v102_v4, %v48_v12 }
  0x1e   :  { %v61_v16 = vmul.f32 %v104_v5, %v60_v13 }
  0x1f   :  { %v50_v17 = vmul.f32 %v49_v14, %v42_v2 }
  0x20   :  { %v62_v20 = vmul.f32 %v61_v16, %v43_v3 }
  0x21   :  { %v52_v21 = vsel %vm51_vm0, %v42_v2, %v50_v17 }
  0x22   :  { %v55_v23 = vsel %vm53_vm1, %v54_v15, %v52_v21  ;;  %v64_v24 = vsel %vm63_vm2, %v43_v3, %v62_v20 }
  0x23   :  { %v70_v25 = vmul.f32 %v68_v19, %v55_v23  ;;  %v67_v26 = vsel %vm65_vm3, %v66_v18, %v64_v24 }
  0x24   :  { %v71_v27 = vmul.f32 %v69_v22, %v67_v26 }
  0x25   :  { %v72_v28 = vadd.f32 %v70_v25, %v40_v0 }
  0x26   :  { %v73_v29 = vadd.f32 %v71_v27, %v41_v1 }
  0x27   :  { %v74_v30 = vmax.f32 %v72_v28, 0.0 }
  0x28   :  { %v75_v31 = vmax.f32 %v73_v29, 0.0 }
  0x29   :  { %v76_v32 = vmin.f32 %v74_v30, 1.0 }
  0x2a   :  { %v77_v33 = vmin.f32 %v75_v31, 1.0 }
  0x2b   :  { %78 = vst [vmem:[#allocation7] sm:$0xff] %v76_v32 }
  0x2c   :  { %79 = vst [vmem:[#allocation7 + $0x8] sm:$0xff] %v77_v33 }
  0x2d   :  { %90 = dma.vmem_to_hbm [thread:$0]  %s86_s1, 256, %s88_s21, [#allocation4]  }
  0x2e   :  { %181 = dma.done.wait [#allocation4], 256  }
  0x2f   :  { %182 = vsyncadd [#allocation4], 4294967040 }
  0x30   :  { %95 = vsyncpa [#allocation3], 1 }
  0x31   :  { %96 = vsyncpa [#allocation6], 1 }
  0x32   :  { %97 = vsyncpa [#allocation4], 1 }

</bundles_post_ra>
